<compile_context>
chip_gen: v6e
topology: v6e:2x2x1
jax: 0.10.0
libtpu: 0.0.40
codegen_flags: <defaults>
</compile_context>

<pallas_src>
import jax
import jax.numpy as jnp
import numpy as np
from jax.experimental import pallas as pl
from jax.experimental.pallas import tpu as pltpu


def _round_up(x, m):
    return ((x + m - 1) // m) * m


def _fused_heads_kernel(h_ref, w1_ref, b1_ref, w2_ref, b2_ref, w3_ref, b3_ref, o_ref):
    # h_ref : (TB, Dp)          f32  activations for this batch tile
    # w1/w2 : (H, Dp, Dp)       bf16 stacked, zero-padded per-head weights
    # w3    : (H, Dp, Op)       bf16
    # b*    : (H, 1, Dp|Op)     f32
    # o_ref : (H, TB, Op)       f32  lane-dense (Op is a multiple of 128)
    H = w1_ref.shape[0]
    cdt = w1_ref.dtype  # MXU input dtype (bf16)

    hb = h_ref[...].astype(cdt)
    hb = jnp.broadcast_to(hb[None, :, :], (H,) + hb.shape)        # (H, TB, Dp)

    # layer 1: batched-over-heads matmul on the MXU, f32 accumulate
    x = jnp.einsum("hbd,hdf->hbf", hb, w1_ref[...],
                   preferred_element_type=jnp.float32)
    x = jnp.maximum(x + b1_ref[...], 0.0)
    # TODO(synk): dropout(p=0.2) omitted — identity in eval mode (training=False).

    # layer 2
    x = jnp.einsum("hbd,hdf->hbf", x.astype(cdt), w2_ref[...],
                   preferred_element_type=jnp.float32)
    x = jnp.maximum(x + b2_ref[...], 0.0)

    # layer 3: padded, lane-dense logits (padded columns are exact zeros)
    o_ref[...] = (
        jnp.einsum("hbd,hdo->hbo", x.astype(cdt), w3_ref[...],
                   preferred_element_type=jnp.float32)
        + b3_ref[...]
    )


def event_discrete_decoder_forward(h, params, disc_num_list):
    """h: (B, dim_in) f32. Returns list of (B, disc_num_list[k]) f32 logits."""
    B, D = h.shape
    H, Dp, _ = params["w1"].shape
    Op = params["w3"].shape[-1]

    # Lane-pad the feature dim to match the pre-padded weights (zeros contribute nothing).
    if Dp != D:
        h = jnp.pad(h, ((0, 0), (0, Dp - D)))

    # Sublane-align the batch and pick a batch tile; pad B up to a tile multiple so
    # the BlockSpec tiling constraint ((8,128)-divisible or full-extent) always holds.
    TB = min(_round_up(B, 8), 128)
    Bp = _round_up(B, TB)
    if Bp != B:
        h = jnp.pad(h, ((0, Bp - B), (0, 0)))
    grid = (Bp // TB,)

    out = pl.pallas_call(
        _fused_heads_kernel,
        out_shape=jax.ShapeDtypeStruct((H, Bp, Op), jnp.float32),
        grid_spec=pltpu.PrefetchScalarGridSpec(
            num_scalar_prefetch=0,
            grid=grid,
            in_specs=[
                pl.BlockSpec((TB, Dp), lambda i: (i, 0)),          # h tile
                pl.BlockSpec((H, Dp, Dp), lambda i: (0, 0, 0)),    # W1 (all heads, resident)
                pl.BlockSpec((H, 1, Dp), lambda i: (0, 0, 0)),     # b1
                pl.BlockSpec((H, Dp, Dp), lambda i: (0, 0, 0)),    # W2
                pl.BlockSpec((H, 1, Dp), lambda i: (0, 0, 0)),     # b2
                pl.BlockSpec((H, Dp, Op), lambda i: (0, 0, 0)),    # W3 (padded)
                pl.BlockSpec((H, 1, Op), lambda i: (0, 0, 0)),     # b3 (padded)
            ],
            out_specs=pl.BlockSpec((H, TB, Op), lambda i: (0, i, 0)),
        ),
        compiler_params=pltpu.CompilerParams(
            dimension_semantics=("parallel",),   # batch-tile axis -> megacore sharding
        ),
    )(h, params["w1"], params["b1"], params["w2"], params["b2"],
      params["w3"], params["b3"])

    # Module semantics: list of per-attribute logits; drop batch / lane padding.
    return [out[k, :B, :n] for k, n in enumerate(disc_num_list)]


def _init_linear(key, fan_in, fan_out):
    # Deterministic stand-in for torch.nn.Linear's default init (W stored transposed).
    kw, kb = jax.random.split(key)
    bound = 1.0 / np.sqrt(fan_in)
    w = jax.random.uniform(kw, (fan_in, fan_out), jnp.float32, -bound, bound)
    b = jax.random.uniform(kb, (fan_out,), jnp.float32, -bound, bound)
    return w, b


def make_params(key, dim_in, disc_num_list, weight_dtype=jnp.bfloat16):
    """Build stacked, lane-padded, bf16 kernel params + unpadded f32 per-head ref params."""
    H = len(disc_num_list)
    Dp = _round_up(dim_in, 128)
    Op = _round_up(max(disc_num_list), 128)

    def pad_w(w, rows, cols):
        return jnp.zeros((rows, cols), jnp.float32).at[: w.shape[0], : w.shape[1]].set(w)

    def pad_b(b, cols):
        return jnp.zeros((cols,), jnp.float32).at[: b.shape[0]].set(b)

    w1s, b1s, w2s, b2s, w3s, b3s = [], [], [], [], [], []
    per_head = []
    keys = jax.random.split(key, H)
    for k, out_dim in enumerate(disc_num_list):
        k1, k2, k3 = jax.random.split(keys[k], 3)
        w1, b1 = _init_linear(k1, dim_in, dim_in)
        w2, b2 = _init_linear(k2, dim_in, dim_in)
        w3, b3 = _init_linear(k3, dim_in, out_dim)
        per_head.append((w1, b1, w2, b2, w3, b3))
        w1s.append(pad_w(w1, Dp, Dp)); b1s.append(pad_b(b1, Dp)[None, :])
        w2s.append(pad_w(w2, Dp, Dp)); b2s.append(pad_b(b2, Dp)[None, :])
        w3s.append(pad_w(w3, Dp, Op)); b3s.append(pad_b(b3, Op)[None, :])

    params = dict(
        w1=jnp.stack(w1s).astype(weight_dtype),
        b1=jnp.stack(b1s),                     # biases stay f32 (bias + ReLU in f32)
        w2=jnp.stack(w2s).astype(weight_dtype),
        b2=jnp.stack(b2s),
        w3=jnp.stack(w3s).astype(weight_dtype),
        b3=jnp.stack(b3s),
    )
    return params, per_head


def ref_forward(h, per_head):
    outs = []
    for (w1, b1, w2, b2, w3, b3) in per_head:
        x = jnp.maximum(h @ w1 + b1, 0.0)
        x = jnp.maximum(x @ w2 + b2, 0.0)
        outs.append(x @ w3 + b3)
    return outs


if __name__ == "__main__":
    key = jax.random.PRNGKey(0)
    k_h, k_p = jax.random.split(key)

    B, dim_in = 8, 32
    disc_num_list = [4, 6, 3]          # number of categories per discrete attribute

    h = jax.random.normal(k_h, (B, dim_in), jnp.float32)
    params, per_head = make_params(k_p, dim_in, disc_num_list)

    outs = event_discrete_decoder_forward(h, params, disc_num_list)
    outs = [jax.block_until_ready(o) for o in outs]

    refs = ref_forward(h, per_head)
    for o, r, n in zip(outs, refs, disc_num_list):
        assert o.shape == (B, n), o.shape
        # tolerance accounts for bf16 weights/activations on the MXU path
        np.testing.assert_allclose(np.asarray(o), np.asarray(r), rtol=3e-2, atol=3e-2)

    print("KERNEL_OK")
</pallas_src>

<mosaic_0001>
module attributes {stable_mosaic.version = 11 : i64} {
  func.func @_fused_heads_kernel(%arg0: i32, %arg1: memref<8x128xf32, #tpu.memory_space<vmem>>, %arg2: memref<3x128x128xbf16, #tpu.memory_space<vmem>>, %arg3: memref<3x1x128xf32, #tpu.memory_space<vmem>>, %arg4: memref<3x128x128xbf16, #tpu.memory_space<vmem>>, %arg5: memref<3x1x128xf32, #tpu.memory_space<vmem>>, %arg6: memref<3x128x128xbf16, #tpu.memory_space<vmem>>, %arg7: memref<3x1x128xf32, #tpu.memory_space<vmem>>, %arg8: memref<3x8x128xf32, #tpu.memory_space<vmem>>) attributes {dimension_semantics = [#tpu.dimension_semantics<parallel>], iteration_bounds = array<i64: 1>, scalar_prefetch = 0 : i64, scratch_operands = 0 : i64, tpu.core_type = #tpu.core_type<tc>, window_params = [{transform_indices = @transform_0, window_bounds = array<i64: 8, 128>}, {pipeline_mode = #tpu.pipeline_mode<synchronous>, transform_indices = @transform_1, window_bounds = array<i64: 3, 128, 128>}, {pipeline_mode = #tpu.pipeline_mode<synchronous>, transform_indices = @transform_2, window_bounds = array<i64: 3, 1, 128>}, {pipeline_mode = #tpu.pipeline_mode<synchronous>, transform_indices = @transform_3, window_bounds = array<i64: 3, 128, 128>}, {pipeline_mode = #tpu.pipeline_mode<synchronous>, transform_indices = @transform_4, window_bounds = array<i64: 3, 1, 128>}, {pipeline_mode = #tpu.pipeline_mode<synchronous>, transform_indices = @transform_5, window_bounds = array<i64: 3, 128, 128>}, {pipeline_mode = #tpu.pipeline_mode<synchronous>, transform_indices = @transform_6, window_bounds = array<i64: 3, 1, 128>}, {transform_indices = @transform_7, window_bounds = array<i64: 3, 8, 128>}]} {
    %c0 = arith.constant 0 : index
    %c0_0 = arith.constant 0 : index
    %0 = vector.load %arg1[%c0, %c0_0] : memref<8x128xf32, #tpu.memory_space<vmem>>, vector<8x128xf32>
    %1 = arith.truncf %0 : vector<8x128xf32> to vector<8x128xbf16>
    %2 = vector.shape_cast %1 : vector<8x128xbf16> to vector<1x8x128xbf16>
    %3 = vector.shape_cast %2 : vector<1x8x128xbf16> to vector<1x8x128xbf16>
    %4 = vector.broadcast %3 : vector<1x8x128xbf16> to vector<3x8x128xbf16>
    %c0_1 = arith.constant 0 : index
    %c0_2 = arith.constant 0 : index
    %c0_3 = arith.constant 0 : index
    %5 = vector.load %arg2[%c0_1, %c0_2, %c0_3] : memref<3x128x128xbf16, #tpu.memory_space<vmem>>, vector<3x128x128xbf16>
    "tpu.trace_start"() <{level = 10 : i32, message = "hbd,hdf->hbf"}> : () -> ()
    %cst = arith.constant dense<0.000000e+00> : vector<3x8x128xf32>
    %6 = tpu.matmul %4, %5, %cst {dimension_numbers = #tpu.dot_dimension_numbers<[2], [1], [1], [2], [0, 0, 0, 1, 1, 2], [0], [0]>} : vector<3x8x128xbf16>, vector<3x128x128xbf16>, vector<3x8x128xf32> -> vector<3x8x128xf32>
    "tpu.trace_stop"() : () -> ()
    %c0_4 = arith.constant 0 : index
    %c0_5 = arith.constant 0 : index
    %c0_6 = arith.constant 0 : index
    %7 = vector.load %arg3[%c0_4, %c0_5, %c0_6] : memref<3x1x128xf32, #tpu.memory_space<vmem>>, vector<3x1x128xf32>
    %8 = vector.broadcast %7 : vector<3x1x128xf32> to vector<3x8x128xf32>
    %9 = arith.addf %6, %8 : vector<3x8x128xf32>
    %cst_7 = arith.constant 0.000000e+00 : f32
    %10 = vector.broadcast %cst_7 : f32 to vector<3x8x128xf32>
    %11 = arith.maximumf %9, %10 : vector<3x8x128xf32>
    %12 = arith.truncf %11 : vector<3x8x128xf32> to vector<3x8x128xbf16>
    %c0_8 = arith.constant 0 : index
    %c0_9 = arith.constant 0 : index
    %c0_10 = arith.constant 0 : index
    %13 = vector.load %arg4[%c0_8, %c0_9, %c0_10] : memref<3x128x128xbf16, #tpu.memory_space<vmem>>, vector<3x128x128xbf16>
    "tpu.trace_start"() <{level = 10 : i32, message = "hbd,hdf->hbf"}> : () -> ()
    %cst_11 = arith.constant dense<0.000000e+00> : vector<3x8x128xf32>
    %14 = tpu.matmul %12, %13, %cst_11 {dimension_numbers = #tpu.dot_dimension_numbers<[2], [1], [1], [2], [0, 0, 0, 1, 1, 2], [0], [0]>} : vector<3x8x128xbf16>, vector<3x128x128xbf16>, vector<3x8x128xf32> -> vector<3x8x128xf32>
    "tpu.trace_stop"() : () -> ()
    %c0_12 = arith.constant 0 : index
    %c0_13 = arith.constant 0 : index
    %c0_14 = arith.constant 0 : index
    %15 = vector.load %arg5[%c0_12, %c0_13, %c0_14] : memref<3x1x128xf32, #tpu.memory_space<vmem>>, vector<3x1x128xf32>
    %16 = vector.broadcast %15 : vector<3x1x128xf32> to vector<3x8x128xf32>
    %17 = arith.addf %14, %16 : vector<3x8x128xf32>
    %cst_15 = arith.constant 0.000000e+00 : f32
    %18 = vector.broadcast %cst_15 : f32 to vector<3x8x128xf32>
    %19 = arith.maximumf %17, %18 : vector<3x8x128xf32>
    %20 = arith.truncf %19 : vector<3x8x128xf32> to vector<3x8x128xbf16>
    %c0_16 = arith.constant 0 : index
    %c0_17 = arith.constant 0 : index
    %c0_18 = arith.constant 0 : index
    %21 = vector.load %arg6[%c0_16, %c0_17, %c0_18] : memref<3x128x128xbf16, #tpu.memory_space<vmem>>, vector<3x128x128xbf16>
    "tpu.trace_start"() <{level = 10 : i32, message = "hbd,hdo->hbo"}> : () -> ()
    %cst_19 = arith.constant dense<0.000000e+00> : vector<3x8x128xf32>
    %22 = tpu.matmul %20, %21, %cst_19 {dimension_numbers = #tpu.dot_dimension_numbers<[2], [1], [1], [2], [0, 0, 0, 1, 1, 2], [0], [0]>} : vector<3x8x128xbf16>, vector<3x128x128xbf16>, vector<3x8x128xf32> -> vector<3x8x128xf32>
    "tpu.trace_stop"() : () -> ()
    %c0_20 = arith.constant 0 : index
    %c0_21 = arith.constant 0 : index
    %c0_22 = arith.constant 0 : index
    %23 = vector.load %arg7[%c0_20, %c0_21, %c0_22] : memref<3x1x128xf32, #tpu.memory_space<vmem>>, vector<3x1x128xf32>
    %24 = vector.broadcast %23 : vector<3x1x128xf32> to vector<3x8x128xf32>
    %25 = arith.addf %22, %24 : vector<3x8x128xf32>
    %c0_23 = arith.constant 0 : index
    %c0_24 = arith.constant 0 : index
    %c0_25 = arith.constant 0 : index
    %26 = vector.load %arg8[%c0_23, %c0_24, %c0_25] : memref<3x8x128xf32, #tpu.memory_space<vmem>>, vector<3x8x128xf32>
    tpu.vector_store %arg8[%c0_23, %c0_24, %c0_25], %25 {strides = array<i32>} : memref<3x8x128xf32, #tpu.memory_space<vmem>>, vector<3x8x128xf32>,
    return
  }
  func.func @transform_0(%arg0: i32) -> (i32, i32) {
    %c0_i32 = arith.constant 0 : i32
    %c0_i32_0 = arith.constant 0 : i32
    return %arg0, %c0_i32 : i32, i32
  }
  func.func @transform_1(%arg0: i32) -> (i32, i32, i32) {
    %c0_i32 = arith.constant 0 : i32
    %c0_i32_0 = arith.constant 0 : i32
    %c0_i32_1 = arith.constant 0 : i32
    %c0_i32_2 = arith.constant 0 : i32
    return %c0_i32, %c0_i32_0, %c0_i32_1 : i32, i32, i32
  }
  func.func @transform_2(%arg0: i32) -> (i32, i32, i32) {
    %c0_i32 = arith.constant 0 : i32
    %c0_i32_0 = arith.constant 0 : i32
    %c0_i32_1 = arith.constant 0 : i32
    %c0_i32_2 = arith.constant 0 : i32
    return %c0_i32, %c0_i32_0, %c0_i32_1 : i32, i32, i32
  }
  func.func @transform_3(%arg0: i32) -> (i32, i32, i32) {
    %c0_i32 = arith.constant 0 : i32
    %c0_i32_0 = arith.constant 0 : i32
    %c0_i32_1 = arith.constant 0 : i32
    %c0_i32_2 = arith.constant 0 : i32
    return %c0_i32, %c0_i32_0, %c0_i32_1 : i32, i32, i32
  }
  func.func @transform_4(%arg0: i32) -> (i32, i32, i32) {
    %c0_i32 = arith.constant 0 : i32
    %c0_i32_0 = arith.constant 0 : i32
    %c0_i32_1 = arith.constant 0 : i32
    %c0_i32_2 = arith.constant 0 : i32
    return %c0_i32, %c0_i32_0, %c0_i32_1 : i32, i32, i32
  }
  func.func @transform_5(%arg0: i32) -> (i32, i32, i32) {
    %c0_i32 = arith.constant 0 : i32
    %c0_i32_0 = arith.constant 0 : i32
    %c0_i32_1 = arith.constant 0 : i32
    %c0_i32_2 = arith.constant 0 : i32
    return %c0_i32, %c0_i32_0, %c0_i32_1 : i32, i32, i32
  }
  func.func @transform_6(%arg0: i32) -> (i32, i32, i32) {
    %c0_i32 = arith.constant 0 : i32
    %c0_i32_0 = arith.constant 0 : i32
    %c0_i32_1 = arith.constant 0 : i32
    %c0_i32_2 = arith.constant 0 : i32
    return %c0_i32, %c0_i32_0, %c0_i32_1 : i32, i32, i32
  }
  func.func @transform_7(%arg0: i32) -> (i32, i32, i32) {
    %c0_i32 = arith.constant 0 : i32
    %c0_i32_0 = arith.constant 0 : i32
    %c0_i32_1 = arith.constant 0 : i32
    return %c0_i32, %arg0, %c0_i32_0 : i32, i32, i32
  }
}

</mosaic_0001>

<bundles_post_ra>
// kernel: tpu_custom_call.1
= control target key start
LH: loop header
LB: loop body
LE: loop exit
PB: predicated region body
PF: predicated region fallthrough
CT: control target
= control target key end

     0   :  { %12 = vsyncpa [#allocation3], 0  ;;  %s1841_s0 = inlined_call_operand.hbm [shape: f32[8,128], index: 0, kind: input, shape index: {}]   ;;  %s1842_s1 = inlined_call_operand.hbm [shape: bf16[3,128,128], index: 1, kind: input, shape index: {}]   ;;  %s1843_s2 = inlined_call_operand.vmem [shape: f32[3,1,128], index: 2, kind: input, shape index: {}]   ;;  %s1844_s3 = inlined_call_operand.hbm [shape: bf16[3,128,128], index: 3, kind: input, shape index: {}]   ;;  %s1845_s4 = inlined_call_operand.vmem [shape: f32[3,1,128], index: 4, kind: input, shape index: {}]   ;;  %s1846_s5 = inlined_call_operand.hbm [shape: bf16[3,128,128], index: 5, kind: input, shape index: {}]   ;;  %s1847_s6 = inlined_call_operand.vmem [shape: f32[3,1,128], index: 6, kind: input, shape index: {}]   ;;  %s1848_s7 = inlined_call_operand.hbm [shape: f32[3,8,128], index: 7, kind: output, shape index: {}]  }
   0x1   :  { %13 = vsyncpa [#allocation6], 0 }
   0x2   :  { %14 = vsyncpa [#allocation9], 0 }
   0x3   :  { %15 = vsyncpa [#allocation4], 0  ;;  %s1649_s24 = smov [#allocation5]  }
   0x4   :  { %s31_s25 = sshll.u32 %s1649_s24, 4  ;;  %s32_s25 = int_to_ptr.vmem [resolvable:$true] %s31_s25 }
   0x5   :  { %s1549_s26 = scalar_lea.vmem %s32_s25, 3072  ;;  %p1554_p1 = scmp.lt.s32.totalorder %s32_s25, %s32_s25 }
   0x6   :  { %p1550_p0 = scmp.ne.s32.totalorder %s32_s25, %s1549_s26  ;;  %p1555_p2 = scmp.lt.s32.totalorder %s1549_s26, %s1549_s26 }
   0x8   :  { %p1556_p3 = por %p1555_p2, %p1554_p1 }
   0xa   :  { %p1557_p4 = pnand %p1556_p3, %p1550_p0 }
   0xc   :  { %1560 = shalt.err (!%p1557_p4)
}
   0xd   :  { %s1650_s27 = smov 64   ;;  %s1651_s28 = smov 4  }
   0xe   :  { %37 = dma.hbm_to_vmem [thread:$0]  %s1842_s1, 3072, %s32_s25, [#allocation6], %s1650_s27, %s1650_s27, %s1651_s28  }
   0xf   :  { %s1652_s8 = smov [#allocation2]   ;;  %s1653_s10 = smov [#allocation7]  }
  0x10   :  { %s22_s9 = sshll.u32 %s1652_s8, 4  ;;  %s45_s11 = sshll.u32 %s1653_s10, 4  ;;  %s23_s9 = int_to_ptr.vmem [resolvable:$true] %s22_s9  ;;  %s46_s11 = int_to_ptr.vmem [resolvable:$true] %s45_s11 }
  0x11   :  { %s1569_s12 = scalar_lea.vmem %s23_s9, 128  ;;  %p1574_p6 = scmp.lt.s32.totalorder %s23_s9, %s23_s9 }
  0x12   :  { %p1570_p5 = scmp.ne.s32.totalorder %s23_s9, %s1569_s12  ;;  %p1575_p7 = scmp.lt.s32.totalorder %s1569_s12, %s1569_s12 }
  0x14   :  { %p1576_p8 = por %p1575_p7, %p1574_p6 }
  0x16   :  { %p1577_p9 = pnand %p1576_p8, %p1570_p5 }
  0x18   :  { %1580 = shalt.err (!%p1577_p9)
}
  0x19   :  { %25 = dma.hbm_to_vmem [thread:$0]  %s1841_s0, 128, %s23_s9, [#allocation3]  }
  0x1a   :  { %s1589_s15 = scalar_lea.vmem %s46_s11, 3072  ;;  %p1594_p11 = scmp.lt.s32.totalorder %s46_s11, %s46_s11 }
  0x1b   :  { %p1590_p10 = scmp.ne.s32.totalorder %s46_s11, %s1589_s15  ;;  %p1595_p12 = scmp.lt.s32.totalorder %s1589_s15, %s1589_s15 }
  0x1d   :  { %p1596_p13 = por %p1595_p12, %p1594_p11 }
  0x1f   :  { %p1597_p0 = pnand %p1596_p13, %p1590_p10 }
  0x21   :  { %1600 = shalt.err (!%p1597_p0)
}
  0x22   :  { %51 = dma.hbm_to_vmem [thread:$0]  %s1844_s3, 3072, %s46_s11, [#allocation6], %s1650_s27, %s1650_s27, %s1651_s28  }
  0x23   :  { %s1654_s17 = smov [#allocation8]  }
  0x24   :  { %s59_s18 = sshll.u32 %s1654_s17, 4  ;;  %s60_s18 = int_to_ptr.vmem [resolvable:$true] %s59_s18 }
  0x25   :  { %s1609_s19 = scalar_lea.vmem %s60_s18, 3072  ;;  %p1614_p2 = scmp.lt.s32.totalorder %s60_s18, %s60_s18 }
  0x26   :  { %p1610_p1 = scmp.ne.s32.totalorder %s60_s18, %s1609_s19  ;;  %p1615_p3 = scmp.lt.s32.totalorder %s1609_s19, %s1609_s19 }
  0x28   :  { %p1616_p4 = por %p1615_p3, %p1614_p2 }
  0x2a   :  { %p1617_p5 = pnand %p1616_p4, %p1610_p1 }
  0x2c   :  { %1620 = shalt.err (!%p1617_p5)
}
  0x2d   :  { %65 = dma.hbm_to_vmem [thread:$0]  %s1846_s5, 3072, %s60_s18, [#allocation9], %s1650_s27, %s1650_s27, %s1651_s28  }
  0x2e   :  { %1641 = dma.done.wait [#allocation3], 128  }
  0x2f   :  { %1642 = vsyncadd [#allocation3], 4294967168 }
  0x30   :  { %1643 = dma.done.wait [#allocation6], 6144  }
  0x31   :  { %1644 = vsyncadd [#allocation6], 4294961152 }
  0x32   :  { %1645 = dma.done.wait [#allocation9], 3072  }
  0x33   :  { %1646 = vsyncadd [#allocation9], 4294964224  ;;  %v1655_v0 = vmov 0.0   ;;  %vm1656_vm0 = vmmov 0   ;;  %v1469_v1 = vld [vmem:[#allocation5 + $0x38] sm:$0xff]   ;;  %v1470_v2 = vld [vmem:[#allocation5 + $0x30] sm:$0xff]  }
  0x34   :  { %1278 = vmatprep.subr.bf16.mxu0 %v1655_v0  ;;  %1298 = vmatprep.subr.bf16.mxu1 %v1655_v0  ;;  %v1471_v3 = vld [vmem:[#allocation5 + $0x28] sm:$0xff]   ;;  %v1476_v4 = vld [vmem:[#allocation5 + $0x78] sm:$0xff]   ;;  %v1478_v5 = vld [vmem:[#allocation5 + $0x70] sm:$0xff]   ;;  %s1657_s10 = smov [#allocation10]  }
  0x35   :  { %1294 = vmatprep.mubr.msk.bf16.mxu0 %vm1656_vm0, %v1655_v0  ;;  %1314 = vmatprep.mubr.msk.bf16.mxu1 %vm1656_vm0, %v1655_v0  ;;  %v1472_v6 = vld [vmem:[#allocation5 + $0x20] sm:$0xff]   ;;  %v1480_v7 = vld [vmem:[#allocation5 + $0x68] sm:$0xff]   ;;  %v1473_v8 = vld [vmem:[#allocation5 + $0x18] sm:$0xff]   ;;  %s1102_s11 = sshll.u32 %s1657_s10, 4  ;;  %s1103_s11 = int_to_ptr.vmem [resolvable:$true] %s1102_s11 }
  0x36   :  { %1279 = vmatpush3.bf16.msra.mxu0 %v1469_v1  ;;  %1299 = vmatpush3.bf16.msra.mxu1 %v1476_v4  ;;  %v1482_v9 = vld [vmem:[#allocation5 + $0x60] sm:$0xff]   ;;  %v1474_v10 = vld [vmem:[#allocation5 + $0x10] sm:$0xff]   ;;  %v1484_v11 = vld [vmem:[#allocation5 + $0x58] sm:$0xff]   ;;  %s1621_s14 = scalar_lea.vmem %s1103_s11, 384  ;;  %p1626_p7 = scmp.lt.s32.totalorder %s1103_s11, %s1103_s11 }
  0x37   :  { %1280 = vmatprep.subr.bf16.mxu0 %v1655_v0  ;;  %1300 = vmatprep.subr.bf16.mxu1 %v1655_v0  ;;  %v1475_v12 = vld [vmem:[#allocation5 + $0x8] sm:$0xff]   ;;  %v1477_v13 = vld [vmem:[#allocation5] sm:$0xff]   ;;  %v1486_v14 = vld [vmem:[#allocation5 + $0x50] sm:$0xff]   ;;  %p1622_p6 = scmp.ne.s32.totalorder %s1103_s11, %s1621_s14  ;;  %p1627_p8 = scmp.lt.s32.totalorder %s1621_s14, %s1621_s14 }
  0x38   :  { %v81_v15 = vld [vmem:[#allocation2] sm:$0xff]  ;;  %v1488_v17 = vld [vmem:[#allocation5 + $0x48] sm:$0xff]   ;;  %v1490_v19 = vld [vmem:[#allocation5 + $0x40] sm:$0xff]  }
  0x39   :  { %v82_v16 = vpack.c.bf16 %v81_v15, %v81_v15  ;;  %v1479_v18 = vld [vmem:[#allocation5 + $0xb8] sm:$0xff]   ;;  %v1481_v20 = vld [vmem:[#allocation5 + $0xb0] sm:$0xff]   ;;  %v1483_v22 = vld [vmem:[#allocation5 + $0xa8] sm:$0xff]   ;;  %p1628_p9 = por %p1627_p8, %p1626_p7 }
  0x3a   :  { %1281 = vmatpush3.bf16.msra.mxu0 %v1470_v2  ;;  %1301 = vmatpush3.bf16.msra.mxu1 %v1478_v5  ;;  %v1493_v21 = vld [vmem:[#allocation7 + $0x38] sm:$0xff]   ;;  %v1494_v23 = vld [vmem:[#allocation7 + $0x30] sm:$0xff]   ;;  %v1485_v24 = vld [vmem:[#allocation5 + $0xa0] sm:$0xff]  }
  0x3b   :  { %1282 = vmatprep.subr.bf16.mxu0 %v1655_v0  ;;  %1302 = vmatprep.subr.bf16.mxu1 %v1655_v0  ;;  %v1495_v25 = vld [vmem:[#allocation7 + $0x28] sm:$0xff]   ;;  %v1487_v26 = vld [vmem:[#allocation5 + $0x98] sm:$0xff]   ;;  %v1496_v27 = vld [vmem:[#allocation7 + $0x20] sm:$0xff]   ;;  %p1629_p10 = pnand %p1628_p9, %p1622_p6 }
  0x3c   :  { %v1489_v28 = vld [vmem:[#allocation5 + $0x90] sm:$0xff]   ;;  %v1497_v29 = vld [vmem:[#allocation7 + $0x18] sm:$0xff]   ;;  %v1491_v30 = vld [vmem:[#allocation5 + $0x88] sm:$0xff]  }
  0x3d   :  { %v1498_v31 = vld [vmem:[#allocation7 + $0x10] sm:$0xff]   ;;  %v1492_v32 = vld [vmem:[#allocation5 + $0x80] sm:$0xff]   ;;  %v1499_v33 = vld [vmem:[#allocation7 + $0x8] sm:$0xff]  }
  0x3e   :  { %1283 = vmatpush3.bf16.msra.mxu0 %v1471_v3  ;;  %1303 = vmatpush3.bf16.msra.mxu1 %v1480_v7  ;;  %v1500_v34 = vld [vmem:[#allocation7 + $0x78] sm:$0xff]   ;;  %v1501_v35 = vld [vmem:[#allocation7] sm:$0xff]   ;;  %v1502_v36 = vld [vmem:[#allocation7 + $0x70] sm:$0xff]  }
  0x3f   :  { %1284 = vmatprep.subr.bf16.mxu0 %v1655_v0  ;;  %1304 = vmatprep.subr.bf16.mxu1 %v1655_v0  ;;  %v1504_v37 = vld [vmem:[#allocation7 + $0x68] sm:$0xff]   ;;  %v1506_v38 = vld [vmem:[#allocation7 + $0x60] sm:$0xff]   ;;  %v1508_v39 = vld [vmem:[#allocation7 + $0x58] sm:$0xff]  }
  0x40   :  { %v1510_v40 = vld [vmem:[#allocation7 + $0x50] sm:$0xff]   ;;  %v1512_v41 = vld [vmem:[#allocation7 + $0x48] sm:$0xff]   ;;  %v1514_v42 = vld [vmem:[#allocation7 + $0x40] sm:$0xff]  }
  0x41   :  { %v1116_v43 = vld [vmem:[%s1843_s2] ss:$0 sm:$0xff]  ;;  %v1117_v51 = vld [vmem:[%s1843_s2 + $0x1] ss:$0 sm:$0xff]  ;;  %v1505_v54 = vld [vmem:[#allocation7 + $0xb0] sm:$0xff]  }
  0x42   :  { %1285 = vmatpush3.bf16.msra.mxu0 %v1472_v6  ;;  %1305 = vmatpush3.bf16.msra.mxu1 %v1482_v9  ;;  %v1503_v49 = vld [vmem:[#allocation7 + $0xb8] sm:$0xff]   ;;  %v1507_v60 = vld [vmem:[#allocation7 + $0xa8] sm:$0xff]   ;;  %v1518_v63 = vld [vmem:[#allocation8 + $0x30] sm:$0xff]  }
  0x43   :  { %1286 = vmatprep.subr.bf16.mxu0 %v1655_v0  ;;  %1306 = vmatprep.subr.bf16.mxu1 %v1655_v0  ;;  %v1517_v59 = vld [vmem:[#allocation8 + $0x38] sm:$0xff]   ;;  %v1509_v1 = vld [vmem:[#allocation7 + $0xa0] sm:$0xff]   ;;  %v1519_v2 = vld [vmem:[#allocation8 + $0x28] sm:$0xff]  }
  0x44   :  { %v1511_v3 = vld [vmem:[#allocation7 + $0x98] sm:$0xff]   ;;  %v1520_v4 = vld [vmem:[#allocation8 + $0x20] sm:$0xff]   ;;  %v1513_v5 = vld [vmem:[#allocation7 + $0x90] sm:$0xff]  }
  0x45   :  { %v1521_v6 = vld [vmem:[#allocation8 + $0x18] sm:$0xff]   ;;  %v1515_v7 = vld [vmem:[#allocation7 + $0x88] sm:$0xff]   ;;  %v1522_v9 = vld [vmem:[#allocation8 + $0x10] sm:$0xff]  }
  0x46   :  { %1287 = vmatpush3.bf16.msra.mxu0 %v1473_v8  ;;  %1307 = vmatpush3.bf16.msra.mxu1 %v1484_v11  ;;  %v1118_v8 = vld [vmem:[%s1843_s2 + $0x2] ss:$0 sm:$0xff]  ;;  %v1516_v11 = vld [vmem:[#allocation7 + $0x80] sm:$0xff]  }
  0x47   :  { %1288 = vmatprep.subr.bf16.mxu0 %v1655_v0  ;;  %1308 = vmatprep.subr.bf16.mxu1 %v1655_v0 }
  0x4a   :  { %1289 = vmatpush3.bf16.msra.mxu0 %v1474_v10  ;;  %1309 = vmatpush3.bf16.msra.mxu1 %v1486_v14 }
  0x4b   :  { %1290 = vmatprep.subr.bf16.mxu0 %v1655_v0  ;;  %1310 = vmatprep.subr.bf16.mxu1 %v1655_v0 }
  0x4e   :  { %1291 = vmatpush3.bf16.msra.mxu0 %v1475_v12  ;;  %1311 = vmatpush3.bf16.msra.mxu1 %v1488_v17 }
  0x4f   :  { %1292 = vmatprep.subr.bf16.mxu0 %v1655_v0  ;;  %1312 = vmatprep.subr.bf16.mxu1 %v1655_v0 }
  0x52   :  { %1293 = vmatpush3.bf16.msra.mxu0 %v1477_v13  ;;  %1313 = vmatpush3.bf16.msra.mxu1 %v1490_v19  ;;  %v1524_v19 = vld [vmem:[#allocation8 + $0x78] sm:$0xff]  }
  0x53   :  { %1318 = vmatprep.subr.bf16.mxu0 %v1655_v0  ;;  %1338 = vmatprep.subr.bf16.mxu1 %v1655_v0 }
  0x55   :  { %1295 = vmatmul.mubr.bf16.vlgmr.msra.gmra.mxu0 %v82_v16  ;;  %1315 = vmatmul.mubr.bf16.vlgmr.msra.gmra.mxu1 %v82_v16 }
  0x56   :  { %1319 = vmatpush3.bf16.msra.mxu0 %v1479_v18  ;;  %1334 = vmatprep.mubr.msk.bf16.mxu0 %vm1656_vm0, %v1655_v0  ;;  %v1523_v18 = vld [vmem:[#allocation8 + $0x8] sm:$0xff]  }
  0x57   :  { %1320 = vmatprep.subr.bf16.mxu0 %v1655_v0  ;;  %1339 = vmatpush3.bf16.msra.mxu1 %v1493_v21  ;;  %v1526_v21 = vld [vmem:[#allocation8 + $0x70] sm:$0xff]  }
  0x58   :  { %1354 = vmatprep.mubr.msk.bf16.mxu1 %vm1656_vm0, %v1655_v0  ;;  %1340 = vmatprep.subr.bf16.mxu1 %v1655_v0 }
  0x5a   :  { %1321 = vmatpush3.bf16.msra.mxu0 %v1481_v20  ;;  %v1525_v20 = vld [vmem:[#allocation8] sm:$0xff]  }
  0x5b   :  { %1322 = vmatprep.subr.bf16.mxu0 %v1655_v0  ;;  %1341 = vmatpush3.bf16.msra.mxu1 %v1494_v23  ;;  %v1530_v23 = vld [vmem:[#allocation8 + $0x60] sm:$0xff]  }
  0x5c   :  { %1342 = vmatprep.subr.bf16.mxu1 %v1655_v0 }
  0x5e   :  { %1323 = vmatpush3.bf16.msra.mxu0 %v1483_v22  ;;  %v1528_v22 = vld [vmem:[#allocation8 + $0x68] sm:$0xff]  }
  0x5f   :  { %1324 = vmatprep.subr.bf16.mxu0 %v1655_v0  ;;  %1343 = vmatpush3.bf16.msra.mxu1 %v1495_v25  ;;  %v1534_v25 = vld [vmem:[#allocation8 + $0x50] sm:$0xff]  }
  0x60   :  { %1344 = vmatprep.subr.bf16.mxu1 %v1655_v0 }
  0x62   :  { %1325 = vmatpush3.bf16.msra.mxu0 %v1485_v24  ;;  %v1532_v24 = vld [vmem:[#allocation8 + $0x58] sm:$0xff]  }
  0x63   :  { %1326 = vmatprep.subr.bf16.mxu0 %v1655_v0  ;;  %1345 = vmatpush3.bf16.msra.mxu1 %v1496_v27  ;;  %v1538_v27 = vld [vmem:[#allocation8 + $0x40] sm:$0xff]  }
  0x64   :  { %1346 = vmatprep.subr.bf16.mxu1 %v1655_v0 }
  0x66   :  { %1327 = vmatpush3.bf16.msra.mxu0 %v1487_v26  ;;  %v1536_v26 = vld [vmem:[#allocation8 + $0x48] sm:$0xff]  }
  0x67   :  { %1328 = vmatprep.subr.bf16.mxu0 %v1655_v0  ;;  %1347 = vmatpush3.bf16.msra.mxu1 %v1497_v29 }
  0x68   :  { %1348 = vmatprep.subr.bf16.mxu1 %v1655_v0 }
  0x6a   :  { %1329 = vmatpush3.bf16.msra.mxu0 %v1489_v28  ;;  %v1143_v28 = vld [vmem:[%s1845_s4] ss:$0 sm:$0xff] }
  0x6b   :  { %1330 = vmatprep.subr.bf16.mxu0 %v1655_v0  ;;  %1349 = vmatpush3.bf16.msra.mxu1 %v1498_v31 }
  0x6c   :  { %1350 = vmatprep.subr.bf16.mxu1 %v1655_v0 }
  0x6e   :  { %1331 = vmatpush3.bf16.msra.mxu0 %v1491_v30 }
  0x6f   :  { %1332 = vmatprep.subr.bf16.mxu0 %v1655_v0  ;;  %1351 = vmatpush3.bf16.msra.mxu1 %v1499_v33 }
  0x70   :  { %1352 = vmatprep.subr.bf16.mxu1 %v1655_v0 }
  0x72   :  { %1333 = vmatpush3.bf16.msra.mxu0 %v1492_v32 }
  0x73   :  { %1358 = vmatprep.subr.bf16.mxu0 %v1655_v0  ;;  %1353 = vmatpush3.bf16.msra.mxu1 %v1501_v35 }
  0x74   :  { %1378 = vmatprep.subr.bf16.mxu1 %v1655_v0 }
  0x75   :  { %1335 = vmatmul.mubr.bf16.vlgmr.msra.gmra.mxu0 %v82_v16 }
  0x76   :  { %1374 = vmatprep.mubr.msk.bf16.mxu0 %vm1656_vm0, %v1655_v0  ;;  %1359 = vmatpush3.bf16.msra.mxu0 %v1500_v34  ;;  %v1527_v34 = vld [vmem:[#allocation8 + $0xb8] sm:$0xff]  }
  0x77   :  { %1360 = vmatprep.subr.bf16.mxu0 %v1655_v0 }
  0x7a   :  { %1361 = vmatpush3.bf16.msra.mxu0 %v1502_v36  ;;  %v1144_v36 = vld [vmem:[%s1845_s4 + $0x1] ss:$0 sm:$0xff] }
  0x7b   :  { %1362 = vmatprep.subr.bf16.mxu0 %v1655_v0 }
  0x7e   :  { %1363 = vmatpush3.bf16.msra.mxu0 %v1504_v37 }
  0x7f   :  { %1364 = vmatprep.subr.bf16.mxu0 %v1655_v0 }
  0x82   :  { %1365 = vmatpush3.bf16.msra.mxu0 %v1506_v38 }
  0x83   :  { %1366 = vmatprep.subr.bf16.mxu0 %v1655_v0 }
  0x86   :  { %1367 = vmatpush3.bf16.msra.mxu0 %v1508_v39  ;;  %v1529_v39 = vld [vmem:[#allocation8 + $0xb0] sm:$0xff]  }
  0x87   :  { %1368 = vmatprep.subr.bf16.mxu0 %v1655_v0 }
  0x8a   :  { %1369 = vmatpush3.bf16.msra.mxu0 %v1510_v40 }
  0x8b   :  { %1370 = vmatprep.subr.bf16.mxu0 %v1655_v0 }
  0x8e   :  { %1371 = vmatpush3.bf16.msra.mxu0 %v1512_v41 }
  0x8f   :  { %1372 = vmatprep.subr.bf16.mxu0 %v1655_v0 }
  0x92   :  { %1373 = vmatpush3.bf16.msra.mxu0 %v1514_v42 }
  0x93   :  { %1398 = vmatprep.subr.bf16.mxu0 %v1655_v0 }
 0x115   :  { %v234_v44 = vpop.f32.mrf.mxu0  ;;  %v322_v53 = vpop.f32.mrf.mxu1 }
 0x116   :  { %v235_v45 = vadd.f32 %v1116_v43, %v234_v44  ;;  %v323_v55 = vadd.f32 %v1117_v51, %v322_v53  ;;  %v1531_v44 = vld [vmem:[#allocation8 + $0xa8] sm:$0xff]   ;;  %v1145_v51 = vld [vmem:[%s1845_s4 + $0x2] ss:$0 sm:$0xff]  ;;  %v1540_v53 = vld [vmem:[#allocation8 + $0x80] sm:$0xff]  }
 0x117   :  { %v1296_v46 = vpop.f32.mrf.mxu0  ;;  %v1316_v56 = vpop.f32.mrf.mxu1 }
 0x118   :  { %v416_v47 = vmax.f32 %v235_v45, 0.0  ;;  %v417_v57 = vmax.f32 %v323_v55, 0.0 }
 0x119   :  { %v237_v48 = vpop.f32.mrf.mxu0  ;;  %v325_v58 = vpop.f32.mrf.mxu1 }
 0x11a   :  { %v419_v50 = vpack.c.bf16 %v416_v47, %v416_v47  ;;  %v420_v61 = vpack.c.bf16 %v417_v57, %v417_v57  ;;  %v1533_v47 = vld [vmem:[#allocation8 + $0xa0] sm:$0xff]   ;;  %v1535_v48 = vld [vmem:[#allocation8 + $0x98] sm:$0xff]  }
 0x11b   :  { %v1297_v52 = vpop.f32.mrf.mxu0  ;;  %v1317_v62 = vpop.f32.mrf.mxu1 }
 0x11c   :  { %1355 = vmatmul.mubr.bf16.vlgmr.msra.gmra.mxu1 %v419_v50  ;;  %1375 = vmatmul.mubr.bf16.vlgmr.msra.gmra.mxu0 %v420_v61  ;;  %v1539_v50 = vld [vmem:[#allocation8 + $0x88] sm:$0xff]  }
 0x11d   :  { %1379 = vmatpush3.bf16.msra.mxu1 %v1503_v49  ;;  %1394 = vmatprep.mubr.msk.bf16.mxu1 %vm1656_vm0, %v1655_v0  ;;  %v1537_v49 = vld [vmem:[#allocation8 + $0x90] sm:$0xff]  }
 0x11e   :  { %1380 = vmatprep.subr.bf16.mxu1 %v1655_v0  ;;  %1399 = vmatpush3.bf16.msra.mxu0 %v1517_v59 }
 0x11f   :  { %1414 = vmatprep.mubr.msk.bf16.mxu0 %vm1656_vm0, %v1655_v0  ;;  %1400 = vmatprep.subr.bf16.mxu0 %v1655_v0 }
 0x121   :  { %1381 = vmatpush3.bf16.msra.mxu1 %v1505_v54 }
 0x122   :  { %1382 = vmatprep.subr.bf16.mxu1 %v1655_v0  ;;  %1401 = vmatpush3.bf16.msra.mxu0 %v1518_v63 }
 0x123   :  { %1402 = vmatprep.subr.bf16.mxu0 %v1655_v0 }
 0x125   :  { %1383 = vmatpush3.bf16.msra.mxu1 %v1507_v60  ;;  %v1170_v60 = vld [vmem:[%s1847_s6] ss:$0 sm:$0xff] }
 0x126   :  { %1384 = vmatprep.subr.bf16.mxu1 %v1655_v0  ;;  %1403 = vmatpush3.bf16.msra.mxu0 %v1519_v2 }
 0x127   :  { %1404 = vmatprep.subr.bf16.mxu0 %v1655_v0 }
 0x129   :  { %1385 = vmatpush3.bf16.msra.mxu1 %v1509_v1 }
 0x12a   :  { %1386 = vmatprep.subr.bf16.mxu1 %v1655_v0  ;;  %1405 = vmatpush3.bf16.msra.mxu0 %v1520_v4 }
 0x12b   :  { %1406 = vmatprep.subr.bf16.mxu0 %v1655_v0 }
 0x12d   :  { %1387 = vmatpush3.bf16.msra.mxu1 %v1511_v3 }
 0x12e   :  { %1388 = vmatprep.subr.bf16.mxu1 %v1655_v0  ;;  %1407 = vmatpush3.bf16.msra.mxu0 %v1521_v6 }
 0x12f   :  { %1408 = vmatprep.subr.bf16.mxu0 %v1655_v0 }
 0x131   :  { %1389 = vmatpush3.bf16.msra.mxu1 %v1513_v5 }
 0x132   :  { %1390 = vmatprep.subr.bf16.mxu1 %v1655_v0  ;;  %1409 = vmatpush3.bf16.msra.mxu0 %v1522_v9 }
 0x133   :  { %1410 = vmatprep.subr.bf16.mxu0 %v1655_v0 }
 0x135   :  { %v410_v10 = vpop.f32.mrf.mxu0  ;;  %1391 = vmatpush3.bf16.msra.mxu1 %v1515_v7 }
 0x136   :  { %v411_v12 = vadd.f32 %v1118_v8, %v410_v10  ;;  %1392 = vmatprep.subr.bf16.mxu1 %v1655_v0  ;;  %1411 = vmatpush3.bf16.msra.mxu0 %v1523_v18  ;;  %v1172_v8 = vld [vmem:[%s1847_s6 + $0x2] ss:$0 sm:$0xff] }
 0x137   :  { %v1336_v13 = vpop.f32.mrf.mxu0  ;;  %1412 = vmatprep.subr.bf16.mxu0 %v1655_v0 }
 0x138   :  { %v418_v14 = vmax.f32 %v411_v12, 0.0 }
 0x139   :  { %v413_v15 = vpop.f32.mrf.mxu0  ;;  %1393 = vmatpush3.bf16.msra.mxu1 %v1516_v11 }
 0x13a   :  { %v421_v16 = vpack.c.bf16 %v418_v14, %v418_v14  ;;  %1418 = vmatprep.subr.bf16.mxu1 %v1655_v0  ;;  %1413 = vmatpush3.bf16.msra.mxu0 %v1525_v20 }
 0x13b   :  { %v1337_v17 = vpop.f32.mrf.mxu0  ;;  %1438 = vmatprep.subr.bf16.mxu0 %v1655_v0 }
 0x13c   :  { %1395 = vmatmul.mubr.bf16.vlgmr.msra.gmra.mxu1 %v421_v16 }
 0x13d   :  { %1434 = vmatprep.mubr.msk.bf16.mxu1 %vm1656_vm0, %v1655_v0  ;;  %1419 = vmatpush3.bf16.msra.mxu1 %v1524_v19 }
 0x13e   :  { %1420 = vmatprep.subr.bf16.mxu1 %v1655_v0 }
 0x141   :  { %1421 = vmatpush3.bf16.msra.mxu1 %v1526_v21 }
 0x142   :  { %1422 = vmatprep.subr.bf16.mxu1 %v1655_v0 }
 0x145   :  { %1423 = vmatpush3.bf16.msra.mxu1 %v1528_v22 }
 0x146   :  { %1424 = vmatprep.subr.bf16.mxu1 %v1655_v0 }
 0x149   :  { %1425 = vmatpush3.bf16.msra.mxu1 %v1530_v23 }
 0x14a   :  { %1426 = vmatprep.subr.bf16.mxu1 %v1655_v0 }
 0x14d   :  { %1427 = vmatpush3.bf16.msra.mxu1 %v1532_v24 }
 0x14e   :  { %1428 = vmatprep.subr.bf16.mxu1 %v1655_v0 }
 0x151   :  { %1429 = vmatpush3.bf16.msra.mxu1 %v1534_v25 }
 0x152   :  { %1430 = vmatprep.subr.bf16.mxu1 %v1655_v0 }
 0x155   :  { %1431 = vmatpush3.bf16.msra.mxu1 %v1536_v26 }
 0x156   :  { %1432 = vmatprep.subr.bf16.mxu1 %v1655_v0 }
 0x159   :  { %1433 = vmatpush3.bf16.msra.mxu1 %v1538_v27 }
 0x1dc   :  { %v573_v29 = vpop.f32.mrf.mxu1  ;;  %v661_v38 = vpop.f32.mrf.mxu0 }
 0x1dd   :  { %v574_v30 = vadd.f32 %v1143_v28, %v573_v29  ;;  %v662_v40 = vadd.f32 %v1144_v36, %v661_v38 }
 0x1de   :  { %v1356_v31 = vpop.f32.mrf.mxu1  ;;  %v1376_v41 = vpop.f32.mrf.mxu0 }
 0x1df   :  { %v755_v32 = vmax.f32 %v574_v30, 0.0  ;;  %v756_v42 = vmax.f32 %v662_v40, 0.0 }
 0x1e0   :  { %v576_v33 = vpop.f32.mrf.mxu1  ;;  %v664_v43 = vpop.f32.mrf.mxu0 }
 0x1e1   :  { %v758_v35 = vpack.c.bf16 %v755_v32, %v755_v32  ;;  %v759_v45 = vpack.c.bf16 %v756_v42, %v756_v42 }
 0x1e2   :  { %v1357_v37 = vpop.f32.mrf.mxu1  ;;  %v1377_v46 = vpop.f32.mrf.mxu0 }
 0x1e3   :  { %1415 = vmatmul.mubr.bf16.vlgmr.msra.gmra.mxu0 %v758_v35  ;;  %1435 = vmatmul.mubr.bf16.vlgmr.msra.gmra.mxu1 %v759_v45 }
 0x1e4   :  { %1439 = vmatpush3.bf16.msra.mxu0 %v1527_v34  ;;  %1454 = vmatprep.mubr.msk.bf16.mxu0 %vm1656_vm0, %v1655_v0 }
 0x1e5   :  { %1440 = vmatprep.subr.bf16.mxu0 %v1655_v0 }
 0x1e8   :  { %1441 = vmatpush3.bf16.msra.mxu0 %v1529_v39 }
 0x1e9   :  { %1442 = vmatprep.subr.bf16.mxu0 %v1655_v0 }
 0x1ec   :  { %1443 = vmatpush3.bf16.msra.mxu0 %v1531_v44 }
 0x1ed   :  { %1444 = vmatprep.subr.bf16.mxu0 %v1655_v0 }
 0x1f0   :  { %1445 = vmatpush3.bf16.msra.mxu0 %v1533_v47 }
 0x1f1   :  { %1446 = vmatprep.subr.bf16.mxu0 %v1655_v0 }
 0x1f4   :  { %1447 = vmatpush3.bf16.msra.mxu0 %v1535_v48 }
 0x1f5   :  { %1448 = vmatprep.subr.bf16.mxu0 %v1655_v0 }
 0x1f8   :  { %1449 = vmatpush3.bf16.msra.mxu0 %v1537_v49 }
 0x1f9   :  { %1450 = vmatprep.subr.bf16.mxu0 %v1655_v0 }
 0x1fc   :  { %v749_v52 = vpop.f32.mrf.mxu1  ;;  %1451 = vmatpush3.bf16.msra.mxu0 %v1539_v50 }
 0x1fd   :  { %v750_v54 = vadd.f32 %v1145_v51, %v749_v52  ;;  %1452 = vmatprep.subr.bf16.mxu0 %v1655_v0  ;;  %v1171_v0 = vld [vmem:[%s1847_s6 + $0x1] ss:$0 sm:$0xff] }
 0x1fe   :  { %v1396_v55 = vpop.f32.mrf.mxu1 }
 0x1ff   :  { %v757_v56 = vmax.f32 %v750_v54, 0.0 }
 0x200   :  { %v752_v57 = vpop.f32.mrf.mxu1  ;;  %1453 = vmatpush3.bf16.msra.mxu0 %v1540_v53 }
 0x201   :  { %v760_v58 = vpack.c.bf16 %v757_v56, %v757_v56 }
 0x202   :  { %v1397_v59 = vpop.f32.mrf.mxu1 }
 0x203   :  { %1455 = vmatmul.mubr.bf16.vlgmr.msra.gmra.mxu0 %v760_v58 }
 0x2a3   :  { %v912_v61 = vpop.f32.mrf.mxu0  ;;  %v1000_v3 = vpop.f32.mrf.mxu1 }
 0x2a4   :  { %v913_v62 = vadd.f32 %v1170_v60, %v912_v61  ;;  %v1001_v4 = vadd.f32 %v1171_v0, %v1000_v3 }
 0x2a5   :  { %v1416_v63 = vpop.f32.mrf.mxu0  ;;  %v1436_v5 = vpop.f32.mrf.mxu1 }
 0x2a6   :  { %1094 = vst [vmem:[#allocation10] sm:$0xff] %v913_v62  ;;  %1095 = vst [vmem:[#allocation10 + $0x8] sm:$0xff] %v1001_v4 }
 0x2a7   :  { %v915_v1 = vpop.f32.mrf.mxu0  ;;  %v1003_v6 = vpop.f32.mrf.mxu1 }
 0x2a9   :  { %v1417_v2 = vpop.f32.mrf.mxu0  ;;  %v1437_v7 = vpop.f32.mrf.mxu1 }
 0x2c3   :  { %v1088_v9 = vpop.f32.mrf.mxu0 }
 0x2c4   :  { %v1089_v10 = vadd.f32 %v1172_v8, %v1088_v9 }
 0x2c5   :  { %v1456_v11 = vpop.f32.mrf.mxu0 }
 0x2c6   :  { %1096 = vst [vmem:[#allocation10 + $0x10] sm:$0xff] %v1089_v10 }
 0x2c7   :  { %v1091_v12 = vpop.f32.mrf.mxu0 }
 0x2c8   :  { %1632 = shalt.err (!%p1629_p10)
}
 0x2c9   :  { %s1658_s15 = smov 128   ;;  %s1659_s1 = smov 8   ;;  %v1457_v13 = vpop.f32.mrf.mxu0 }
 0x2ca   :  { %1108 = dma.vmem_to_hbm [thread:$0]  %s1103_s11, 384, %s1848_s7, [#allocation4], %s1658_s15, %s1658_s15, %s1659_s1  }
 0x2cb   :  { %1647 = dma.done.wait [#allocation4], 384  }
 0x2cc   :  { %1648 = vsyncadd [#allocation4], 4294966912 }
 0x2cd   :  { %1112 = vsyncpa [#allocation3], 1 }
 0x2ce   :  { %1113 = vsyncpa [#allocation6], 1 }
 0x2cf   :  { %1114 = vsyncpa [#allocation9], 1 }
 0x2d0   :  { %1115 = vsyncpa [#allocation4], 1 }

</bundles_post_ra>
